<compile_context>
chip_gen: v7x
topology: tpu7x:2x2x1
jax: 0.10.0
libtpu: 0.0.40
codegen_flags: <defaults>
</compile_context>

<pallas_src>
import functools

import jax
import jax.numpy as jnp
from jax.experimental import pallas as pl
from jax.experimental.pallas import tpu as pltpu


def _round_up(x, m):
    return (x + m - 1) // m * m


def qnet_kernel(xt_ref, w1t_ref, b1_ref, w2t_ref, b2_ref, ot_ref):
    # xt_ref: (n_in, tb) bf16, batch on the lane axis.
    # First matmul on the MXU: (hidden, n_in) @ (n_in, tb) -> f32 (hidden, tb).
    h = jnp.dot(w1t_ref[...], xt_ref[...], preferred_element_type=jnp.float32)
    # Bias add + ReLU in f32 on the VPU (v5e has no bf16 VPU/EUP).
    h = jnp.maximum(h + b1_ref[...], 0.0)
    # Second matmul: (n_out_pad, hidden) @ (hidden, tb) -> f32 (n_out_pad, tb).
    o = jnp.dot(w2t_ref[...], h.astype(w2t_ref.dtype),
                preferred_element_type=jnp.float32)
    ot_ref[...] = (o + b2_ref[...]).astype(ot_ref.dtype)


def init_qnetwork_params(key, n_input, n_output, hidden=128):
    """Deterministic PyTorch-style init: U(-1/sqrt(fan_in), 1/sqrt(fan_in)).
    Weights stored (in_features, out_features) for the pure-JAX reference."""
    k1, k2, k3, k4 = jax.random.split(key, 4)
    bound1 = 1.0 / jnp.sqrt(jnp.float32(n_input))
    bound2 = 1.0 / jnp.sqrt(jnp.float32(hidden))
    w1 = jax.random.uniform(k1, (n_input, hidden), jnp.float32, -bound1, bound1)
    b1 = jax.random.uniform(k2, (hidden,), jnp.float32, -bound1, bound1)
    w2 = jax.random.uniform(k3, (hidden, n_output), jnp.float32, -bound2, bound2)
    b2 = jax.random.uniform(k4, (n_output,), jnp.float32, -bound2, bound2)
    return w1, b1, w2, b2


def prepare_qnetwork_params(w1, b1, w2, b2, compute_dtype=jnp.bfloat16):
    """One-time prep (outside the hot path): transpose weights to the
    batch-on-lanes layout, cast MXU operands to bf16, reshape biases to
    column vectors, and pad n_output up to 8 sublanes only."""
    n_in, hidden = w1.shape
    n_out = int(w2.shape[1])
    n_out_pad = _round_up(max(n_out, 1), 8)

    w1t = w1.T.astype(compute_dtype)                    # (hidden, n_in)
    b1c = b1.reshape(hidden, 1).astype(jnp.float32)     # (hidden, 1)

    w2t = jnp.zeros((n_out_pad, hidden), compute_dtype)
    w2t = w2t.at[:n_out, :].set(w2.T.astype(compute_dtype))   # (8, hidden)
    b2c = jnp.zeros((n_out_pad, 1), jnp.float32)
    b2c = b2c.at[:n_out, 0].set(b2.astype(jnp.float32))       # (8, 1)

    return {"w1t": w1t, "b1": b1c, "w2t": w2t, "b2": b2c, "n_out": n_out}


@functools.partial(jax.jit, static_argnums=(5, 6))
def _qnet_fwd(x, w1t, b1, w2t, b2, n_out, block_batch):
    B, n_in = x.shape
    hidden = w1t.shape[0]
    n_out_pad = w2t.shape[0]
    compute_dtype = w1t.dtype

    # Batch tile: multiple of 128 lanes; >= 2 grid steps whenever B > 128 so
    # both v7x TensorCores engage; capped by block_batch to bound VMEM.
    tb = max(128, _round_up(min(int(block_batch), pl.cdiv(B, 2)), 128))
    b_pad = _round_up(B, tb)
    grid = (b_pad // tb,)

    # Single fused XLA pass over x: cast to bf16, transpose to (n_in, B),
    # pad the lane (batch) axis up to a multiple of tb.
    xt = x.astype(compute_dtype).T
    if b_pad != B:
        xt = jnp.pad(xt, ((0, 0), (0, b_pad - B)))

    flops = 2 * b_pad * n_in * hidden + 2 * b_pad * hidden * n_out_pad
    bytes_accessed = (
        xt.size * xt.dtype.itemsize
        + w1t.size * w1t.dtype.itemsize
        + b1.size * b1.dtype.itemsize
        + w2t.size * w2t.dtype.itemsize
        + b2.size * b2.dtype.itemsize
        + n_out_pad * b_pad * 4
    )

    out_t = pl.pallas_call(
        qnet_kernel,
        out_shape=jax.ShapeDtypeStruct((n_out_pad, b_pad), jnp.float32),
        grid=grid,
        in_specs=[
            pl.BlockSpec((n_in, tb), lambda i: (0, i)),           # streamed cols
            pl.BlockSpec((hidden, n_in), lambda i: (0, 0)),       # resident
            pl.BlockSpec((hidden, 1), lambda i: (0, 0)),          # resident
            pl.BlockSpec((n_out_pad, hidden), lambda i: (0, 0)),  # resident
            pl.BlockSpec((n_out_pad, 1), lambda i: (0, 0)),       # resident
        ],
        out_specs=pl.BlockSpec((n_out_pad, tb), lambda i: (0, i)),
        compiler_params=pltpu.CompilerParams(
            dimension_semantics=("parallel",)),
        cost_estimate=pl.CostEstimate(
            flops=flops, transcendentals=0, bytes_accessed=bytes_accessed),
    )(xt, w1t, b1, w2t, b2)

    # Drop padded output rows/columns; restore (B, n_out) orientation (tiny).
    return out_t[:n_out, :B].T


def qnetwork_forward(x, params, *, block_batch=8192):
    """x: (B, n_input) float; params from prepare_qnetwork_params."""
    return _qnet_fwd(x, params["w1t"], params["b1"], params["w2t"],
                     params["b2"], params["n_out"], block_batch)


def qnetwork_act(obs, params):
    """Equivalent of Qnetwork.act: greedy action for one observation."""
    # TODO(synk): fuse the argmax (over the 8 padded sublanes, with -inf mask
    # on rows >= n_out) into the kernel epilogue for the latency-critical
    # single-observation path; kept as a tiny host/XLA argmax here.
    q = qnetwork_forward(jnp.asarray(obs, jnp.float32)[None, :], params)
    return int(jnp.argmax(q))


if __name__ == "__main__":
    # Small shapes consistent with a Q-network: obs dim 4, 2 actions, batch 8.
    batch, n_input, n_output = 8, 4, 2

    key = jax.random.PRNGKey(0)
    k_x, k_p = jax.random.split(key)
    x = jax.random.normal(k_x, (batch, n_input), dtype=jnp.float32)
    w1, b1, w2, b2 = init_qnetwork_params(k_p, n_input, n_output)
    params = prepare_qnetwork_params(w1, b1, w2, b2)

    out = qnetwork_forward(x, params)
    out = jax.block_until_ready(out)
    assert out.shape == (batch, n_output)

    # Reference performing the same bf16-operand / f32-accumulate math.
    cd = jnp.bfloat16
    h_ref = jnp.dot(x.astype(cd), w1.astype(cd),
                    preferred_element_type=jnp.float32) + b1
    h_ref = jnp.maximum(h_ref, 0.0)
    ref = jnp.dot(h_ref.astype(cd), w2.astype(cd),
                  preferred_element_type=jnp.float32) + b2
    assert jnp.allclose(out, ref, atol=2e-3, rtol=2e-3)

    # Looser sanity check against the full-f32 PyTorch math.
    ref_f32 = jnp.maximum(x @ w1 + b1, 0.0) @ w2 + b2
    assert jnp.allclose(out, ref_f32, atol=5e-2, rtol=5e-2)

    # Exercise the multi-tile grid path (B not a multiple of the batch tile,
    # grid of 2 steps -> both v7x TensorCores on the "parallel" axis).
    x_big = jax.random.normal(k_x, (300, n_input), dtype=jnp.float32)
    out_big = jax.block_until_ready(
        qnetwork_forward(x_big, params, block_batch=256))
    ref_big = jnp.maximum(x_big @ w1 + b1, 0.0) @ w2 + b2
    assert out_big.shape == (300, n_output)
    assert jnp.allclose(out_big, ref_big, atol=5e-2, rtol=5e-2)

    # Greedy action helper (host-side argmax, mirrors Qnetwork.act).
    action = qnetwork_act(x[0], params)
    assert 0 <= action < n_output

    print("KERNEL_OK")
</pallas_src>

<mosaic_0001>
module attributes {stable_mosaic.version = 11 : i64} {
  func.func @qnet_kernel(%arg0: i32, %arg1: memref<4x128xbf16, #tpu.memory_space<vmem>>, %arg2: memref<128x4xbf16, #tpu.memory_space<vmem>>, %arg3: memref<128x1xf32, #tpu.memory_space<vmem>>, %arg4: memref<8x128xbf16, #tpu.memory_space<vmem>>, %arg5: memref<8x1xf32, #tpu.memory_space<vmem>>, %arg6: memref<8x128xf32, #tpu.memory_space<vmem>>) attributes {dimension_semantics = [#tpu.dimension_semantics<parallel>], iteration_bounds = array<i64: 1>, scalar_prefetch = 0 : i64, scratch_operands = 0 : i64, tpu.core_type = #tpu.core_type<tc>, window_params = [{transform_indices = @transform_0, window_bounds = array<i64: 4, 128>}, {pipeline_mode = #tpu.pipeline_mode<synchronous>, transform_indices = @transform_1, window_bounds = array<i64: 128, 4>}, {pipeline_mode = #tpu.pipeline_mode<synchronous>, transform_indices = @transform_2, window_bounds = array<i64: 128, 1>}, {pipeline_mode = #tpu.pipeline_mode<synchronous>, transform_indices = @transform_3, window_bounds = array<i64: 8, 128>}, {pipeline_mode = #tpu.pipeline_mode<synchronous>, transform_indices = @transform_4, window_bounds = array<i64: 8, 1>}, {transform_indices = @transform_5, window_bounds = array<i64: 8, 128>}]} {
    %c0 = arith.constant 0 : index
    %c0_0 = arith.constant 0 : index
    %0 = vector.load %arg2[%c0, %c0_0] : memref<128x4xbf16, #tpu.memory_space<vmem>>, vector<128x4xbf16>
    %c0_1 = arith.constant 0 : index
    %c0_2 = arith.constant 0 : index
    %1 = vector.load %arg1[%c0_1, %c0_2] : memref<4x128xbf16, #tpu.memory_space<vmem>>, vector<4x128xbf16>
    %cst = arith.constant dense<0.000000e+00> : vector<128x128xf32>
    %2 = tpu.matmul %0, %1, %cst {dimension_numbers = #tpu.dot_dimension_numbers<[1], [0], [0], [1], [0, 0, 1, 1], [], []>} : vector<128x4xbf16>, vector<4x128xbf16>, vector<128x128xf32> -> vector<128x128xf32>
    %c0_3 = arith.constant 0 : index
    %c0_4 = arith.constant 0 : index
    %3 = vector.load %arg3[%c0_3, %c0_4] : memref<128x1xf32, #tpu.memory_space<vmem>>, vector<128x1xf32>
    %4 = vector.broadcast %3 : vector<128x1xf32> to vector<128x128xf32>
    %5 = arith.addf %2, %4 : vector<128x128xf32>
    %cst_5 = arith.constant 0.000000e+00 : f32
    %6 = vector.broadcast %cst_5 : f32 to vector<128x128xf32>
    %7 = arith.maximumf %5, %6 : vector<128x128xf32>
    %c0_6 = arith.constant 0 : index
    %c0_7 = arith.constant 0 : index
    %8 = vector.load %arg4[%c0_6, %c0_7] : memref<8x128xbf16, #tpu.memory_space<vmem>>, vector<8x128xbf16>
    %9 = arith.truncf %7 : vector<128x128xf32> to vector<128x128xbf16>
    %cst_8 = arith.constant dense<0.000000e+00> : vector<8x128xf32>
    %10 = tpu.matmul %8, %9, %cst_8 {dimension_numbers = #tpu.dot_dimension_numbers<[1], [0], [0], [1], [0, 0, 1, 1], [], []>} : vector<8x128xbf16>, vector<128x128xbf16>, vector<8x128xf32> -> vector<8x128xf32>
    %c0_9 = arith.constant 0 : index
    %c0_10 = arith.constant 0 : index
    %11 = vector.load %arg5[%c0_9, %c0_10] : memref<8x1xf32, #tpu.memory_space<vmem>>, vector<8x1xf32>
    %12 = vector.broadcast %11 : vector<8x1xf32> to vector<8x128xf32>
    %13 = arith.addf %10, %12 : vector<8x128xf32>
    %c0_11 = arith.constant 0 : index
    %c0_12 = arith.constant 0 : index
    %14 = vector.load %arg6[%c0_11, %c0_12] : memref<8x128xf32, #tpu.memory_space<vmem>>, vector<8x128xf32>
    tpu.vector_store %arg6[%c0_11, %c0_12], %13 {strides = array<i32>} : memref<8x128xf32, #tpu.memory_space<vmem>>, vector<8x128xf32>,
    return
  }
  func.func @transform_0(%arg0: i32) -> (i32, i32) {
    %c0_i32 = arith.constant 0 : i32
    %c0_i32_0 = arith.constant 0 : i32
    return %c0_i32, %arg0 : i32, i32
  }
  func.func @transform_1(%arg0: i32) -> (i32, i32) {
    %c0_i32 = arith.constant 0 : i32
    %c0_i32_0 = arith.constant 0 : i32
    %c0_i32_1 = arith.constant 0 : i32
    return %c0_i32, %c0_i32_0 : i32, i32
  }
  func.func @transform_2(%arg0: i32) -> (i32, i32) {
    %c0_i32 = arith.constant 0 : i32
    %c0_i32_0 = arith.constant 0 : i32
    %c0_i32_1 = arith.constant 0 : i32
    return %c0_i32, %c0_i32_0 : i32, i32
  }
  func.func @transform_3(%arg0: i32) -> (i32, i32) {
    %c0_i32 = arith.constant 0 : i32
    %c0_i32_0 = arith.constant 0 : i32
    %c0_i32_1 = arith.constant 0 : i32
    return %c0_i32, %c0_i32_0 : i32, i32
  }
  func.func @transform_4(%arg0: i32) -> (i32, i32) {
    %c0_i32 = arith.constant 0 : i32
    %c0_i32_0 = arith.constant 0 : i32
    %c0_i32_1 = arith.constant 0 : i32
    return %c0_i32, %c0_i32_0 : i32, i32
  }
  func.func @transform_5(%arg0: i32) -> (i32, i32) {
    %c0_i32 = arith.constant 0 : i32
    %c0_i32_0 = arith.constant 0 : i32
    return %c0_i32, %arg0 : i32, i32
  }
}

</mosaic_0001>

<bundles_post_ra>
// kernel: _qnet_fwd.1
= control target key start
LH: loop header
LB: loop body
LE: loop exit
PB: predicated region body
PF: predicated region fallthrough
CT: control target
= control target key end

     0   :  { %vm199_vm0 = vcmask 1041408   ;;  %vm174_vm1 = vcmask 31744   ;;  %v462_v1 = vmov 0   ;;  %v463_v28 = vmov 0.0   ;;  %s596_s0 = inlined_call_operand.vmem [shape: bf16[4,128], index: 0, kind: input, shape index: {}]   ;;  %s597_s1 = inlined_call_operand.vmem [shape: bf16[128,4], index: 1, kind: input, shape index: {}]   ;;  %s598_s2 = inlined_call_operand.vmem [shape: f32[128,1], index: 2, kind: input, shape index: {}]   ;;  %s599_s4 = inlined_call_operand.vmem [shape: f32[8,1], index: 4, kind: input, shape index: {}]   ;;  %s600_s3 = inlined_call_operand.vmem [shape: bf16[8,128], index: 3, kind: input, shape index: {}]   ;;  %s601_s5 = inlined_call_operand.vmem [shape: f32[8,128], index: 5, kind: output, shape index: {}]  }
   0x1   :  { %v37_v0 = vld [vmem:[%s596_s0] sm:$0x3]  ;;  %452 = vset.pattern.permute.xlu0 %v462_v1  ;;  %453 = vset.pattern.permute.xlu1 %v462_v1  ;;  %v455_v4 = vld [vmem:[%s597_s1 + $0x8] sm:$0xff]   ;;  %v456_v5 = vld [vmem:[%s597_s1 + $0x10] sm:$0xff]   ;;  %vm464_vm2 = vmmov 0  }
   0x2   :  { %448 = vmatprep.subr.msk.bf16.mxu0 %vm199_vm0, %v37_v0  ;;  %v201_v2 = vsel %vm199_vm0, %v37_v0, 0  ;;  %v454_v3 = vld [vmem:[%s597_s1] sm:$0xff]   ;;  %v457_v7 = vld [vmem:[%s597_s1 + $0x18] sm:$0xff]   ;;  %v40_v8 = vld [vmem:[%s598_s2 + $0x10] sm:$0xff]  ;;  %428 = vmatprep.subr.bf16.mxu1 %v463_v28 }
   0x3   :  { %411 = vmatpush3.bf16.msra.mxu0 %v201_v2  ;;  %412 = vmatprep.mubr.msk.bf16.mxu0 %vm174_vm1, %v454_v3  ;;  %v38_v6 = vld [vmem:[%s598_s2] sm:$0xff]  ;;  %v39_v10 = vld [vmem:[%s598_s2 + $0x8] sm:$0xff]  ;;  %v41_v11 = vld [vmem:[%s598_s2 + $0x18] sm:$0xff] }
   0x4   :  { %56 = vperm.xlu0 %452, %v38_v6   ;;  %v458_v9 = vld [vmem:[%s597_s1 + $0x20] sm:$0xff]   ;;  %66 = vperm.xlu1 %453, %v40_v8   ;;  %v43_v13 = vld [vmem:[%s598_s2 + $0x28] sm:$0xff]  ;;  %v460_v15 = vld [vmem:[%s597_s1 + $0x30] sm:$0xff]  }
   0x5   :  { %v42_v12 = vld [vmem:[%s598_s2 + $0x20] sm:$0xff]  ;;  %v459_v14 = vld [vmem:[%s597_s1 + $0x28] sm:$0xff]   ;;  %v44_v16 = vld [vmem:[%s598_s2 + $0x30] sm:$0xff]  ;;  %444 = vmatprep.mubr.msk.bf16.mxu1 %vm464_vm2, %v463_v28 }
   0x6   :  { %413 = vmatmul.mubr.msk.bf16.vlgmr.msra.gmra.mrb[0].mxu0 %vm174_vm1, %v455_v4  ;;  %v45_v17 = vld [vmem:[%s598_s2 + $0x38] sm:$0xff]  ;;  %v46_v18 = vld [vmem:[%s598_s2 + $0x40] sm:$0xff]  ;;  %v47_v19 = vld [vmem:[%s598_s2 + $0x48] sm:$0xff] }
   0x7   :  { %416 = vmatprep.mubr.msk.bf16.mxu0 %vm174_vm1, %v456_v5  ;;  %v461_v20 = vld [vmem:[%s597_s1 + $0x38] sm:$0xff]   ;;  %v48_v21 = vld [vmem:[%s598_s2 + $0x50] sm:$0xff]  ;;  %v50_v23 = vld [vmem:[%s598_s2 + $0x60] sm:$0xff] }
   0x8   :  { %61 = vperm.xlu0 %452, %v39_v10   ;;  %71 = vperm.xlu1 %453, %v41_v11   ;;  %v49_v22 = vld [vmem:[%s598_s2 + $0x58] sm:$0xff]  ;;  %v51_v24 = vld [vmem:[%s598_s2 + $0x68] sm:$0xff]  ;;  %v52_v25 = vld [vmem:[%s598_s2 + $0x70] sm:$0xff] }
   0x9   :  { %v53_v26 = vld [vmem:[%s598_s2 + $0x78] sm:$0xff]  ;;  %v325_v27 = vld [vmem:[%s599_s4] sm:$0xff] }
   0xc   :  { %76 = vperm.xlu0 %452, %v42_v12   ;;  %81 = vperm.xlu1 %453, %v43_v13  }
   0xe   :  { %417 = vmatmul.mubr.msk.bf16.gmra.mrb[4].mxu0 %vm174_vm1, %v457_v7 }
   0xf   :  { %420 = vmatprep.mubr.msk.bf16.mxu0 %vm174_vm1, %v458_v9 }
  0x10   :  { %86 = vperm.xlu0 %452, %v44_v16   ;;  %91 = vperm.xlu1 %453, %v45_v17  }
  0x14   :  { %96 = vperm.xlu0 %452, %v46_v18   ;;  %101 = vperm.xlu1 %453, %v47_v19  }
  0x16   :  { %421 = vmatmul.mubr.msk.bf16.gmra.mrb[8].mxu0 %vm174_vm1, %v459_v14 }
  0x17   :  { %424 = vmatprep.mubr.msk.bf16.mxu0 %vm174_vm1, %v460_v15 }
  0x18   :  { %106 = vperm.xlu0 %452, %v48_v21   ;;  %111 = vperm.xlu1 %453, %v49_v22  }
  0x1c   :  { %116 = vperm.xlu0 %452, %v50_v23   ;;  %121 = vperm.xlu1 %453, %v51_v24  }
  0x1e   :  { %425 = vmatmul.mubr.msk.bf16.gmra.mrb[12].mxu0 %vm174_vm1, %v461_v20 }
  0x20   :  { %126 = vperm.xlu0 %452, %v52_v25   ;;  %131 = vperm.xlu1 %453, %v53_v26  }
  0x24   :  { %328 = vperm.xlu0 %452, %v325_v27  }
  0x83   :  { %v57_v29 = vpop.permute.xlu0 %56  ;;  %v67_v30 = vpop.permute.xlu1 %66 }
  0x87   :  { %v62_v31 = vpop.permute.xlu0 %61  ;;  %v72_v32 = vpop.permute.xlu1 %71 }
  0x8b   :  { %v77_v33 = vpop.permute.xlu0 %76  ;;  %v82_v34 = vpop.permute.xlu1 %81 }
  0x8f   :  { %v87_v35 = vpop.permute.xlu0 %86  ;;  %v92_v39 = vpop.permute.xlu1 %91 }
  0x93   :  { %v97_v47 = vpop.permute.xlu0 %96  ;;  %v102_v51 = vpop.permute.xlu1 %101 }
  0x97   :  { %v107_v60 = vpop.permute.xlu0 %106  ;;  %v112_v0 = vpop.permute.xlu1 %111 }
  0x9b   :  { %v117_v8 = vpop.permute.xlu0 %116  ;;  %v122_v13 = vpop.permute.xlu1 %121 }
  0x9f   :  { %v127_v20 = vpop.permute.xlu0 %126  ;;  %v132_v25 = vpop.permute.xlu1 %131 }
  0xd9   :  { %v414_v36 = vpop.f32.mrb[0].mxu0 }
  0xda   :  { %v246_v37 = vadd.f32 %v414_v36, %v67_v30  ;;  %v237_v38 = vpop.f32.mrb[1].mxu0 }
  0xdb   :  { %v238_v40 = vadd.f32 %v237_v38, %v57_v29  ;;  %v415_v41 = vpop.f32.mrb[2].mxu0  ;;  %v316_v38 = vld [vmem:[%s600_s3] sm:$0xf] }
  0xdc   :  { %v249_v42 = vadd.f32 %v415_v41, %v72_v32  ;;  %v240_v43 = vpop.f32.mrb[3].mxu0  ;;  %v302_v45 = vmax.f32 %v246_v37, 0.0 }
  0xdd   :  { %v241_v44 = vadd.f32 %v240_v43, %v62_v31  ;;  %v300_v48 = vmax.f32 %v238_v40, 0.0 }
  0xde   :  { %v303_v46 = vmax.f32 %v249_v42, 0.0 }
  0xdf   :  { %v301_v49 = vmax.f32 %v241_v44, 0.0 }
  0xe0   :  { %v318_v50 = vpack.c.bf16 %v303_v46, %v302_v45 }
  0xe1   :  { %v418_v52 = vpop.f32.mrb[4].mxu0  ;;  %v317_v53 = vpack.c.bf16 %v301_v49, %v300_v48 }
  0xe2   :  { %v262_v54 = vadd.f32 %v418_v52, %v87_v35  ;;  %v253_v55 = vpop.f32.mrb[5].mxu0 }
  0xe3   :  { %v254_v56 = vadd.f32 %v253_v55, %v77_v33  ;;  %v419_v57 = vpop.f32.mrb[6].mxu0  ;;  %429 = vmatpush3.bf16.msra.mxu1 %v317_v53 }
  0xe4   :  { %v265_v58 = vadd.f32 %v419_v57, %v92_v39  ;;  %v256_v59 = vpop.f32.mrb[7].mxu0  ;;  %430 = vmatprep.subr.bf16.mxu1 %v463_v28  ;;  %v306_v62 = vmax.f32 %v262_v54, 0.0  ;;  %v329_v39 = vpop.permute.xlu0 %328 }
  0xe5   :  { %v257_v61 = vadd.f32 %v256_v59, %v82_v34  ;;  %v304_v1 = vmax.f32 %v254_v56, 0.0 }
  0xe6   :  { %v307_v63 = vmax.f32 %v265_v58, 0.0 }
  0xe7   :  { %v305_v2 = vmax.f32 %v257_v61, 0.0  ;;  %431 = vmatpush3.bf16.msra.mxu1 %v318_v50 }
  0xe8   :  { %v320_v3 = vpack.c.bf16 %v307_v63, %v306_v62  ;;  %432 = vmatprep.subr.bf16.mxu1 %v463_v28 }
  0xe9   :  { %v319_v4 = vpack.c.bf16 %v305_v2, %v304_v1  ;;  %v422_v5 = vpop.f32.mrb[8].mxu0 }
  0xea   :  { %v278_v6 = vadd.f32 %v422_v5, %v107_v60  ;;  %v269_v7 = vpop.f32.mrb[9].mxu0 }
  0xeb   :  { %v270_v9 = vadd.f32 %v269_v7, %v97_v47  ;;  %v423_v10 = vpop.f32.mrb[10].mxu0  ;;  %433 = vmatpush3.bf16.msra.mxu1 %v319_v4 }
  0xec   :  { %v281_v11 = vadd.f32 %v423_v10, %v112_v0  ;;  %v272_v12 = vpop.f32.mrb[11].mxu0  ;;  %434 = vmatprep.subr.bf16.mxu1 %v463_v28  ;;  %v310_v15 = vmax.f32 %v278_v6, 0.0 }
  0xed   :  { %v273_v14 = vadd.f32 %v272_v12, %v102_v51  ;;  %v308_v17 = vmax.f32 %v270_v9, 0.0 }
  0xee   :  { %v311_v16 = vmax.f32 %v281_v11, 0.0 }
  0xef   :  { %v309_v18 = vmax.f32 %v273_v14, 0.0  ;;  %435 = vmatpush3.bf16.msra.mxu1 %v320_v3 }
  0xf0   :  { %v322_v19 = vpack.c.bf16 %v311_v16, %v310_v15  ;;  %436 = vmatprep.subr.bf16.mxu1 %v463_v28 }
  0xf1   :  { %v321_v21 = vpack.c.bf16 %v309_v18, %v308_v17  ;;  %v426_v22 = vpop.f32.mrb[12].mxu0 }
  0xf2   :  { %v294_v23 = vadd.f32 %v426_v22, %v127_v20  ;;  %v285_v24 = vpop.f32.mrb[13].mxu0 }
  0xf3   :  { %v286_v26 = vadd.f32 %v285_v24, %v117_v8  ;;  %v427_v27 = vpop.f32.mrb[14].mxu0  ;;  %437 = vmatpush3.bf16.msra.mxu1 %v321_v21 }
  0xf4   :  { %v297_v29 = vadd.f32 %v427_v27, %v132_v25  ;;  %v288_v30 = vpop.f32.mrb[15].mxu0  ;;  %438 = vmatprep.subr.bf16.mxu1 %v463_v28  ;;  %v314_v32 = vmax.f32 %v294_v23, 0.0 }
  0xf5   :  { %v289_v31 = vadd.f32 %v288_v30, %v122_v13  ;;  %v312_v34 = vmax.f32 %v286_v26, 0.0 }
  0xf6   :  { %v315_v33 = vmax.f32 %v297_v29, 0.0 }
  0xf7   :  { %v313_v35 = vmax.f32 %v289_v31, 0.0  ;;  %439 = vmatpush3.bf16.msra.mxu1 %v322_v19 }
  0xf8   :  { %v324_v36 = vpack.c.bf16 %v315_v33, %v314_v32  ;;  %440 = vmatprep.subr.bf16.mxu1 %v463_v28 }
  0xf9   :  { %v323_v37 = vpack.c.bf16 %v313_v35, %v312_v34 }
  0xfb   :  { %441 = vmatpush3.bf16.msra.mxu1 %v323_v37 }
  0xfc   :  { %442 = vmatprep.subr.bf16.mxu1 %v463_v28 }
  0xff   :  { %443 = vmatpush3.bf16.msra.mxu1 %v324_v36 }
 0x102   :  { %445 = vmatmul.mubr.bf16.vlgmr.msra.gmra.mrb[0].mxu1 %v316_v38 }
 0x1d5   :  { %v365_v40 = vpop.f32.mrb[0].mxu1 }
 0x1d6   :  { %v366_v41 = vadd.f32 %v365_v40, %v329_v39  ;;  %v446_v42 = vpop.f32.mrb[1].mxu1 }
 0x1d7   :  { %v368_v43 = vpop.f32.mrb[2].mxu1 }
 0x1d8   :  { %371 = vst [vmem:[%s601_s5] sm:$0xff] %v366_v41  ;;  %v447_v44 = vpop.f32.mrb[3].mxu1 }

</bundles_post_ra>
